<compile_context>
chip_gen: v6e
topology: v6e:2x2x1
jax: 0.10.0
libtpu: 0.0.40
codegen_flags: <defaults>
</compile_context>

<pallas_src>
import functools

import jax
import jax.numpy as jnp
from jax.experimental import pallas as pl
from jax.experimental.pallas import tpu as pltpu

LANE = 128
ROW_ALIGN = 64                     # multiple of sublane packing for f32/bf16/int8
TARGET_TILE_BYTES = 2 * 1024 * 1024  # ~2 MiB per input tile: 2 in x 2 bufs = 8 MiB


def _round_up(x: int, m: int) -> int:
    return ((x + m - 1) // m) * m


def _sq_err_partial_kernel(pred_ref, tgt_ref, out_ref, acc_ref, *,
                           block_rows: int, n_valid_rows: int):
    """Accumulates sum((pred - tgt)^2) into an (8,128) VMEM scratch.

    The scalar (1,1) output is written only once, at the last grid step.
    """
    i = pl.program_id(0)

    @pl.when(i == 0)
    def _():
        acc_ref[...] = jnp.zeros_like(acc_ref)

    d = pred_ref[...].astype(jnp.float32) - tgt_ref[...].astype(jnp.float32)
    sq = d * d

    # Mask rows beyond the real array extent (only emitted when the last block
    # is partial; shapes are static, so this is a compile-time decision).
    if n_valid_rows % block_rows != 0:
        row = i * block_rows + jax.lax.broadcasted_iota(
            jnp.int32, (block_rows, LANE), 0)
        sq = jnp.where(row < n_valid_rows, sq, 0.0)

    # Per-sublane/lane accumulate: (block_rows,128) -> (block_rows//8, 8, 128),
    # sum over the leading axis = a chain of whole-vreg VPU adds (no XLU work).
    acc_ref[...] += jnp.sum(sq.reshape(block_rows // 8, 8, LANE), axis=0)

    @pl.when(i == pl.num_programs(0) - 1)
    def _():
        out_ref[...] = jnp.sum(acc_ref[...]).reshape(1, 1)


@functools.partial(jax.jit, static_argnames=("reduction",))
def mse_metric_pallas(targets: jax.Array, predictions: jax.Array,
                      reduction: str = "mean") -> jax.Array:
    """compute_metric(targets, predictions) with torch.nn.MSELoss semantics."""
    if reduction not in ("mean", "sum"):
        raise ValueError(f"Unsupported reduction: {reduction}")
    assert predictions.shape == targets.shape

    n_elems = predictions.size
    if n_elems == 0:
        # Empty batch: 'sum' -> 0, 'mean' -> NaN (matches torch.nn.MSELoss).
        return jnp.float32(0.0) if reduction == "sum" else jnp.float32(jnp.nan)

    # Flatten in the ORIGINAL dtype (no f32 upcast copy in HBM).
    pred_flat = predictions.reshape(-1)
    tgt_flat = targets.reshape(-1)

    # Ragged tail (< 128 elements): handled in plain JAX, no jnp.pad copy.
    rem = n_elems % LANE
    if rem:
        split = n_elems - rem
        td = (pred_flat[split:].astype(jnp.float32)
              - tgt_flat[split:].astype(jnp.float32))
        tail_sum = jnp.sum(td * td)
        pred_flat = pred_flat[:split]
        tgt_flat = tgt_flat[:split]
    else:
        tail_sum = jnp.float32(0.0)

    rows = pred_flat.size // LANE
    if rows == 0:
        total = tail_sum
    else:
        pred2d = pred_flat.reshape(rows, LANE)
        tgt2d = tgt_flat.reshape(rows, LANE)

        # ~2 MiB per input tile in the native dtype, rounded to sublane packing.
        itemsize = jnp.dtype(predictions.dtype).itemsize
        max_rows = max(ROW_ALIGN,
                       (TARGET_TILE_BYTES // (LANE * itemsize))
                       // ROW_ALIGN * ROW_ALIGN)
        block_rows = min(max_rows, _round_up(rows, ROW_ALIGN))
        n_tiles = pl.cdiv(rows, block_rows)

        # TODO(synk): on v7x, a leading size-2 "parallel" grid axis (one block
        # range per TensorCore, partial sums combined in the wrapper) would
        # engage the second core; single-core is kept here for simplicity.
        bulk_sum = pl.pallas_call(
            functools.partial(_sq_err_partial_kernel,
                              block_rows=block_rows, n_valid_rows=rows),
            out_shape=jax.ShapeDtypeStruct((1, 1), jnp.float32),
            grid_spec=pltpu.PrefetchScalarGridSpec(
                num_scalar_prefetch=0,
                grid=(n_tiles,),
                in_specs=[
                    pl.BlockSpec((block_rows, LANE), lambda i: (i, 0)),
                    pl.BlockSpec((block_rows, LANE), lambda i: (i, 0)),
                ],
                out_specs=pl.BlockSpec((1, 1), lambda i: (0, 0)),
                scratch_shapes=[pltpu.VMEM((8, LANE), jnp.float32)],
            ),
            compiler_params=pltpu.CompilerParams(
                dimension_semantics=("arbitrary",),
                vmem_limit_bytes=32 * 1024 * 1024,
            ),
        )(pred2d, tgt2d)[0, 0]
        total = bulk_sum + tail_sum

    if reduction == "mean":
        return total / jnp.float32(n_elems)
    return total


class MetricPallas:
    """Mirrors mlwiz Metric.forward: returns {name: compute_metric(y_true, y_pred)}.

    Event-handler / epoch-accumulation bookkeeping (on_training_epoch_*, state
    updates, .backward()) is host-side training-loop plumbing, not kernel work.
    """
    # TODO(synk): the abstract base exposes no concrete compute_metric; MSE
    # (the default imported loss) with reduction='mean' is used as the concrete
    # metric here.

    def __init__(self, use_as_loss: bool = False, reduction: str = "mean",
                 accumulate_over_epoch: bool = True, force_cpu: bool = True,
                 device: str = "cpu", **kwargs):
        self.use_as_loss = use_as_loss
        self.reduction = reduction
        self.accumulate_over_epoch = accumulate_over_epoch
        self.force_cpu = force_cpu
        self.device = device

    @property
    def name(self) -> str:
        return self.__class__.__name__

    def get_main_metric_name(self) -> str:
        return self.name

    def get_predictions_and_targets(self, targets, *outputs):
        # Default behaviour of concrete subclasses: model's first output vs targets.
        return outputs[0], targets

    def compute_metric(self, targets, predictions):
        return mse_metric_pallas(targets, predictions, reduction=self.reduction)

    def forward(self, targets, *outputs) -> dict:
        y_pred_batch, y_true_batch = self.get_predictions_and_targets(
            targets, *outputs)
        return {self.name: self.compute_metric(y_true_batch, y_pred_batch)}

    __call__ = forward


if __name__ == "__main__":
    key = jax.random.PRNGKey(0)
    k1, k2, k3, k4 = jax.random.split(key, 4)

    # Case 1: f32 model outputs / targets, mean reduction (batch=16, hidden=32).
    batch, hidden = 16, 32
    model_out = jax.random.normal(k1, (batch, hidden), dtype=jnp.float32)
    targets = jax.random.normal(k2, (batch, hidden), dtype=jnp.float32)

    metric = MetricPallas(use_as_loss=True, reduction="mean")
    value = jax.block_until_ready(metric(targets, model_out)[metric.name])
    ref = jnp.mean((model_out - targets) ** 2)
    assert jnp.allclose(value, ref, rtol=1e-5, atol=1e-6), (value, ref)

    # Case 2: bf16 inputs with a ragged element count (not a multiple of 128);
    # exercises the native-dtype streaming, in-kernel masking, and JAX tail path.
    p_bf = jax.random.normal(k3, (7, 33), dtype=jnp.float32).astype(jnp.bfloat16)
    t_bf = jax.random.normal(k4, (7, 33), dtype=jnp.float32).astype(jnp.bfloat16)
    v2 = jax.block_until_ready(mse_metric_pallas(t_bf, p_bf, reduction="mean"))
    ref2 = jnp.mean((p_bf.astype(jnp.float32) - t_bf.astype(jnp.float32)) ** 2)
    assert jnp.allclose(v2, ref2, rtol=1e-5, atol=1e-6), (v2, ref2)

    # Case 3: sum reduction.
    metric_sum = MetricPallas(reduction="sum")
    v3 = jax.block_until_ready(metric_sum(targets, model_out)[metric_sum.name])
    ref3 = jnp.sum((model_out - targets) ** 2)
    assert jnp.allclose(v3, ref3, rtol=1e-5, atol=1e-5), (v3, ref3)

    print("KERNEL_OK")
</pallas_src>

<mosaic_0001>
module attributes {stable_mosaic.version = 11 : i64} {
  func.func @_sq_err_partial_kernel(%arg0: i32, %arg1: memref<64x128xf32, #tpu.memory_space<vmem>>, %arg2: memref<64x128xf32, #tpu.memory_space<vmem>>, %arg3: memref<1x1xf32, #tpu.memory_space<vmem>>, %arg4: memref<8x128xf32, #tpu.memory_space<vmem>>) attributes {dimension_semantics = [#tpu.dimension_semantics<arbitrary>], iteration_bounds = array<i64: 1>, scalar_prefetch = 0 : i64, scratch_operands = 1 : i64, tpu.core_type = #tpu.core_type<tc>, window_params = [{transform_indices = @transform_0, window_bounds = array<i64: 64, 128>}, {transform_indices = @transform_1, window_bounds = array<i64: 64, 128>}, {pipeline_mode = #tpu.pipeline_mode<synchronous>, transform_indices = @transform_2, window_bounds = array<i64: 1, 1>}]} {
    %c0_i32 = arith.constant 0 : i32
    %0 = arith.cmpi eq, %arg0, %c0_i32 : i32
    %1 = arith.extui %0 : i1 to i32
    %c0_i32_0 = arith.constant 0 : i32
    %2 = arith.cmpi ne, %1, %c0_i32_0 : i32
    scf.if %2 {
      %cst_11 = arith.constant 0.000000e+00 : f32
      %23 = vector.broadcast %cst_11 : f32 to vector<8x128xf32>
      %c0_12 = arith.constant 0 : index
      %c0_13 = arith.constant 0 : index
      %24 = vector.load %arg4[%c0_12, %c0_13] : memref<8x128xf32, #tpu.memory_space<vmem>>, vector<8x128xf32>
      tpu.vector_store %arg4[%c0_12, %c0_13], %23 {strides = array<i32>} : memref<8x128xf32, #tpu.memory_space<vmem>>, vector<8x128xf32>,
    } else {
    }
    %c0 = arith.constant 0 : index
    %c0_1 = arith.constant 0 : index
    %3 = vector.load %arg1[%c0, %c0_1] : memref<64x128xf32, #tpu.memory_space<vmem>>, vector<64x128xf32>
    %c0_2 = arith.constant 0 : index
    %c0_3 = arith.constant 0 : index
    %4 = vector.load %arg2[%c0_2, %c0_3] : memref<64x128xf32, #tpu.memory_space<vmem>>, vector<64x128xf32>
    %5 = arith.subf %3, %4 : vector<64x128xf32>
    %6 = arith.mulf %5, %5 : vector<64x128xf32>
    %c64_i32 = arith.constant 64 : i32
    %7 = arith.muli %arg0, %c64_i32 : i32
    %8 = tpu.iota {dimensions = array<i32: 0>} : vector<64x128xi32>
    %9 = vector.broadcast %7 : i32 to vector<64x128xi32>
    %10 = arith.addi %9, %8 : vector<64x128xi32>
    %c4_i32 = arith.constant 4 : i32
    %11 = vector.broadcast %c4_i32 : i32 to vector<64x128xi32>
    %12 = arith.cmpi slt, %10, %11 : vector<64x128xi32>
    %cst = arith.constant 0.000000e+00 : f32
    %13 = vector.broadcast %cst : f32 to vector<64x128xf32>
    %14 = arith.select %12, %6, %13 : vector<64x128xi1>, vector<64x128xf32>
    %c0_4 = arith.constant 0 : index
    %c0_5 = arith.constant 0 : index
    %15 = vector.load %arg4[%c0_4, %c0_5] : memref<8x128xf32, #tpu.memory_space<vmem>>, vector<8x128xf32>
    %16 = vector.shape_cast %14 : vector<64x128xf32> to vector<8x8x128xf32>
    %cst_6 = arith.constant dense<0.000000e+00> : vector<8x128xf32>
    %17 = vector.multi_reduction <add>, %16, %cst_6 [0] : vector<8x8x128xf32> to vector<8x128xf32>
    %18 = arith.addf %15, %17 : vector<8x128xf32>
    %c0_7 = arith.constant 0 : index
    %c0_8 = arith.constant 0 : index
    %19 = vector.load %arg4[%c0_7, %c0_8] : memref<8x128xf32, #tpu.memory_space<vmem>>, vector<8x128xf32>
    tpu.vector_store %arg4[%c0_7, %c0_8], %18 {strides = array<i32>} : memref<8x128xf32, #tpu.memory_space<vmem>>, vector<8x128xf32>,
    %c0_i32_9 = arith.constant 0 : i32
    %20 = arith.cmpi eq, %arg0, %c0_i32_9 : i32
    %21 = arith.extui %20 : i1 to i32
    %c0_i32_10 = arith.constant 0 : i32
    %22 = arith.cmpi ne, %21, %c0_i32_10 : i32
    scf.if %22 {
      %c0_11 = arith.constant 0 : index
      %c0_12 = arith.constant 0 : index
      %23 = vector.load %arg4[%c0_11, %c0_12] : memref<8x128xf32, #tpu.memory_space<vmem>>, vector<8x128xf32>
      %24 = vector.shape_cast %23 : vector<8x128xf32> to vector<1x8x128xf32>
      %cst_13 = arith.constant dense<0.000000e+00> : vector<1xf32>
      %25 = vector.multi_reduction <add>, %24, %cst_13 [1, 2] : vector<1x8x128xf32> to vector<1xf32>
      %26 = vector.shape_cast %25 : vector<1xf32> to vector<1x1x1xf32>
      %27 = vector.extract %26[0, 0, 0] : f32 from vector<1x1x1xf32>
      %28 = vector.broadcast %27 : f32 to vector<1x1xf32>
      %c0_14 = arith.constant 0 : index
      %c0_15 = arith.constant 0 : index
      %29 = vector.load %arg3[%c0_14, %c0_15] : memref<1x1xf32, #tpu.memory_space<vmem>>, vector<1x1xf32>
      tpu.vector_store %arg3[%c0_14, %c0_15], %28 {strides = array<i32>} : memref<1x1xf32, #tpu.memory_space<vmem>>, vector<1x1xf32>,
    } else {
    }
    return
  }
  func.func @transform_0(%arg0: i32) -> (i32, i32) {
    %c0_i32 = arith.constant 0 : i32
    %c0_i32_0 = arith.constant 0 : i32
    return %arg0, %c0_i32 : i32, i32
  }
  func.func @transform_1(%arg0: i32) -> (i32, i32) {
    %c0_i32 = arith.constant 0 : i32
    %c0_i32_0 = arith.constant 0 : i32
    return %arg0, %c0_i32 : i32, i32
  }
  func.func @transform_2(%arg0: i32) -> (i32, i32) {
    %c0_i32 = arith.constant 0 : i32
    %c0_i32_0 = arith.constant 0 : i32
    %c0_i32_1 = arith.constant 0 : i32
    return %c0_i32, %c0_i32_0 : i32, i32
  }
}

</mosaic_0001>

<bundles_post_ra>
// kernel: mse_metric_pallas.1
= control target key start
LH: loop header
LB: loop body
LE: loop exit
PB: predicated region body
PF: predicated region fallthrough
CT: control target
= control target key end

     0   :  { %v50_v2 = vlaneseq  ;;  %s174_s0 = inlined_call_operand.vmem [shape: f32[4,128], index: 0, kind: input, shape index: {}]   ;;  %s175_s1 = inlined_call_operand.vmem [shape: f32[4,128], index: 1, kind: input, shape index: {}]   ;;  %s176_s2 = inlined_call_operand.hbm [shape: f32[1,1], index: 2, kind: output, shape index: {}]  }
   0x1   :  { %v17_v0 = vld [vmem:[%s174_s0] sm:$0xff] }
   0x2   :  { %v25_v1 = vld [vmem:[%s175_s1] sm:$0xff] }
   0x3   :  { %7 = vsyncpa [#allocation4], 0  ;;  %v33_v3 = vsub.f32 %v17_v0, %v25_v1  ;;  %v51_v4 = vshrl.u32 %v50_v2, 7  ;;  %s149_s0 = smov [#allocation3]   ;;  %vm108_vm1 = vcmask 0  }
   0x4   :  { %s116_s13 = sshll.u32 %s149_s0, 4  ;;  %s117_s13 = int_to_ptr.vmem [resolvable:$true] %s116_s13 }
   0x5   :  { %v41_v5 = vmul.f32 %v33_v3, %v33_v3  ;;  %vm68_vm0 = vcmp.lt.s32.totalorder %v51_v4, 4  ;;  %s127_s14 = scalar_lea.vmem %s117_s13, 16  ;;  %s131_s15 = scalar_lea.vmem %s117_s13, 32 }
   0x6   :  { %p128_p0 = scmp.ne.s32.totalorder %s117_s13, %s127_s14  ;;  %p132_p1 = scmp.lt.s32.totalorder %s117_s13, %s117_s13 }
   0x7   :  { %v76_v6 = vsel %vm68_vm0, %v41_v5, 0.0  ;;  %p133_p2 = scmp.lt.s32.totalorder %s131_s15, %s127_s14 }
   0x8   :  { %98 = vadd.xlane.f32.xlu0 %v76_v6 }
   0x9   :  { %p134_p3 = por %p133_p2, %p132_p1 }
   0xb   :  { %p135_p4 = pnand %p134_p3, %p128_p0 }
  0x91   :  { %v99_v7 = vpop.xlane.xlu0 %98 }
  0x92   :  { %v100_v8 = vrot.slane %v99_v7, 4 }
  0x94   :  { %v101_v9 = vadd.f32 %v100_v8, %v99_v7 }
  0x96   :  { %v102_v10 = vrot.slane %v101_v9, 2 }
  0x98   :  { %v103_v11 = vadd.f32 %v102_v10, %v101_v9 }
  0x9a   :  { %v104_v12 = vrot.slane %v103_v11, 1 }
  0x9c   :  { %v105_v13 = vadd.f32 %v104_v12, %v103_v11 }
  0x9e   :  { %124 = vpush %v105_v13 }
  0xcf   :  { %s125_s1 = spop %124 }
  0xd0   :  { %v107_v14 = vstv %s125_s1 }
  0xd1   :  { %109 = vst.msk [vmem:[#allocation3] sm:$0x1] %vm108_vm1, %v107_v14 }
  0xd2   :  { %138 = shalt.err (!%p135_p4)
}
  0xd3   :  { %119 = dma.vmem_to_hbm [thread:$0]  %s117_s13, 16, %s176_s2, [#allocation4]  }
  0xd4   :  { %147 = dma.done.wait [#allocation4], 16  }
  0xd5   :  { %148 = vsyncadd [#allocation4], 4294967280 }
  0xd6   :  { %123 = vsyncpa [#allocation4], 1 }

</bundles_post_ra>
